<compile_context>
chip_gen: v5e
topology: v5e:2x2
jax: 0.10.0
libtpu: 0.0.40
codegen_flags: <defaults>
</compile_context>

<pallas_src>
import functools

import jax
import jax.numpy as jnp
from jax.experimental import pallas as pl
from jax.experimental.pallas import tpu as pltpu


_SUBLANES = {4: 8, 2: 16, 1: 32}      # f32 / bf16 / int8 sublane packing


def _vmem_capacity_bytes():
    """Per-core VMEM capacity; conservative 64 MiB (v7x) if the query fails."""
    try:
        cap = int(pltpu.get_tpu_info().vmem_capacity_bytes)
        if 16 * 1024 * 1024 <= cap <= 256 * 1024 * 1024:
            return cap
    except Exception:
        pass
    return 64 * 1024 * 1024


def _divisors(n):
    ds = []
    i = 1
    while i * i <= n:
        if n % i == 0:
            ds.append(i)
            if i != n // i:
                ds.append(n // i)
        i += 1
    return ds


def _ceil_to(x, m):
    return -(-x // m) * m


def _streamed_block_cost(rt, lt, itemsize):
    """Worst-case live VMEM bytes per grid step of the streamed kernels."""
    sub = _SUBLANES.get(itemsize, 8)
    native = _ceil_to(rt, sub) * _ceil_to(lt, 128) * itemsize   # x / y tile
    f32 = _ceil_to(rt, 8) * _ceil_to(lt, 128) * 4               # f32 working copy
    vec = _ceil_to(rt, 8) * 128 * 4                             # (rt,1) gamma/shift/psum
    return 4 * native + 2 * f32 + 6 * vec


def _pick_tiles(R, L, itemsize, block_budget):
    """Exact-divisor, (8,128)-aligned (row, lane) tiles under the VMEM budget.

    Prefers the widest lane tile (contiguous DMA), then the tallest row tile
    that fits, keeping per-step block volume near the budget."""
    row_cands = sorted({d for d in _divisors(R) if d % 8 == 0} | {R},
                       reverse=True)
    lane_cands = sorted({d for d in _divisors(L) if d % 128 == 0} | {L},
                        reverse=True)
    for lt in lane_cands:
        for rt in row_cands:
            if _streamed_block_cost(rt, lt, itemsize) <= block_budget:
                return rt, lt
    # TODO(synk): pathological shapes (no aligned divisor fits the budget) —
    # fall back to the smallest aligned candidates and rely on vmem_limit slack.
    return row_cands[-1], lane_cands[-1]


def _resident_cost_bytes(N, C, L, itemsize):
    sub = _SUBLANES.get(itemsize, 8)
    native = N * _ceil_to(C, sub) * _ceil_to(L, 128) * itemsize
    f32 = N * _ceil_to(C, 8) * _ceil_to(L, 128) * 4
    return 4 * native + 3 * f32


# --------------------------------------------------------------------------
# Kernels
# --------------------------------------------------------------------------
def _resident_kernel(x_ref, gamma_ref, beta_ref, rm_ref, out_ref, new_rm_ref,
                     *, inv_total, momentum):
    """Single pass over VMEM-resident x: stats + affine (1 HBM read + 1 write)."""
    x = x_ref[...].astype(jnp.float32)                                   # (N, C, L)
    mean = jnp.sum(jnp.sum(x, axis=2, keepdims=True), axis=0) * inv_total  # (C, 1)
    gamma = gamma_ref[...]                                               # (C, 1) f32
    shift = beta_ref[...] - mean * gamma                                 # fold subtraction
    new_rm_ref[...] = ((1.0 - momentum) * rm_ref[...]
                       + momentum * mean).astype(new_rm_ref.dtype)
    out_ref[...] = (x * gamma + shift).astype(out_ref.dtype)


def _rowsum_kernel(x_ref, psum_ref):
    """Per-row (= per (n, c)) sums, accumulated in the resident output block
    across the lane grid axis (reduction axis last, row axis parallel)."""
    s = jnp.sum(x_ref[...].astype(jnp.float32), axis=1, keepdims=True)   # (rt, 1)

    @pl.when(pl.program_id(1) == 0)
    def _first():
        psum_ref[...] = s

    @pl.when(pl.program_id(1) != 0)
    def _rest():
        psum_ref[...] += s


def _affine_kernel(x_ref, g_ref, s_ref, o_ref):
    """y = x * gamma_row + shift_row  (mean subtraction folded into shift)."""
    x = x_ref[...].astype(jnp.float32)
    o_ref[...] = (x * g_ref[...] + s_ref[...]).astype(o_ref.dtype)


# --------------------------------------------------------------------------
# Wrapper
# --------------------------------------------------------------------------
def mean_only_batchnorm_nchw(x, weight, bias, running_mean, momentum=0.1,
                             training=True, allow_fast_path=True):
    """Forward of MeanOnlyBatchNorm(dim=4) on NCHW input.

    Returns (output, new_running_mean).  JAX is functional, so the updated
    running-mean buffer is returned instead of mutated in place.
    # TODO(synk): the dim=2 (N, F) branch of the module is not kernelized here.
    """
    N, C, H, W = x.shape
    L = H * W
    R = N * C
    itemsize = x.dtype.itemsize
    total = N * L

    cap = _vmem_capacity_bytes()
    vmem_limit = int(min(cap, max(cap - (6 << 20), 32 << 20)))
    block_budget = max(cap // 8, 2 << 20)

    gamma_f = weight.astype(jnp.float32)
    beta_f = bias.astype(jnp.float32)
    rm_f = running_mean.astype(jnp.float32)

    # ---- Fast path: whole activation resident in VMEM (1 read + 1 write). ----
    if (training and allow_fast_path
            and _resident_cost_bytes(N, C, L, itemsize) <= cap - (8 << 20)):
        x3 = x.reshape(N, C, L)                                   # free reshape
        vec_spec = pl.BlockSpec((C, 1), lambda i: (0, 0))
        full_spec = pl.BlockSpec((N, C, L), lambda i: (0, 0, 0))
        out3, new_rm = pl.pallas_call(
            functools.partial(_resident_kernel,
                              inv_total=1.0 / float(total),
                              momentum=float(momentum)),
            out_shape=(jax.ShapeDtypeStruct((N, C, L), x.dtype),
                       jax.ShapeDtypeStruct((C, 1), running_mean.dtype)),
            grid=(1,),
            in_specs=[full_spec, vec_spec, vec_spec, vec_spec],
            out_specs=(full_spec, vec_spec),
            compiler_params=pltpu.CompilerParams(
                dimension_semantics=("arbitrary",),
                vmem_limit_bytes=vmem_limit),
        )(x3, gamma_f.reshape(C, 1), beta_f.reshape(C, 1), rm_f.reshape(C, 1))
        return out3.reshape(N, C, H, W), new_rm.reshape(C)

    # ---- Streamed path: (N*C, H*W) row view, big (8,128)-aligned tiles. ----
    x2 = x.reshape(R, L)                                          # free reshape
    rt, lt = _pick_tiles(R, L, itemsize, block_budget)
    grid = (R // rt, L // lt)

    if training:
        # Pass 1: per-row partial sums (row axis parallel across cores,
        # lane axis is the in-VMEM reduction axis).
        psums = pl.pallas_call(
            _rowsum_kernel,
            out_shape=jax.ShapeDtypeStruct((R, 1), jnp.float32),
            grid=grid,
            in_specs=[pl.BlockSpec((rt, lt), lambda r, l: (r, l))],
            out_specs=pl.BlockSpec((rt, 1), lambda r, l: (r, 0)),
            compiler_params=pltpu.CompilerParams(
                dimension_semantics=("parallel", "arbitrary"),
                vmem_limit_bytes=vmem_limit),
        )(x2)
        # Tiny (N*C,) -> (C,) combine + running-mean update in plain JAX.
        mean = jnp.sum(psums.reshape(N, C), axis=0) / float(total)       # (C,)
        new_rm = ((1.0 - momentum) * rm_f
                  + momentum * mean).astype(running_mean.dtype)
    else:
        mean = rm_f
        new_rm = running_mean

    shift = beta_f - mean * gamma_f                                      # (C,)
    g_rows = jnp.broadcast_to(gamma_f[None, :], (N, C)).reshape(R, 1)
    s_rows = jnp.broadcast_to(shift[None, :], (N, C)).reshape(R, 1)

    # Pass 2: elementwise affine, fully parallel (both v7x TensorCores stream).
    # TODO(synk): if profiling shows exposed DMA at row-block boundaries, add
    # pipeline_mode=pl.Buffered(3) to the x spec (and widen the budget check).
    y2 = pl.pallas_call(
        _affine_kernel,
        out_shape=jax.ShapeDtypeStruct((R, L), x.dtype),
        grid=grid,
        in_specs=[pl.BlockSpec((rt, lt), lambda r, l: (r, l)),
                  pl.BlockSpec((rt, 1), lambda r, l: (r, 0)),
                  pl.BlockSpec((rt, 1), lambda r, l: (r, 0))],
        out_specs=pl.BlockSpec((rt, lt), lambda r, l: (r, l)),
        compiler_params=pltpu.CompilerParams(
            dimension_semantics=("parallel", "parallel"),
            vmem_limit_bytes=vmem_limit),
    )(x2, g_rows, s_rows)

    return y2.reshape(N, C, H, W), new_rm


if __name__ == "__main__":
    key = jax.random.PRNGKey(0)
    N, C, H, W = 2, 4, 16, 16
    x = jax.random.normal(key, (N, C, H, W), dtype=jnp.float32)

    # Deterministic, non-trivial parameters (stronger check than ones/zeros).
    weight = 1.0 + 0.1 * jnp.arange(C, dtype=jnp.float32)
    bias = 0.05 * jnp.arange(C, dtype=jnp.float32) - 0.1
    running_mean = 0.02 * jnp.arange(C, dtype=jnp.float32)
    momentum = 0.1

    # References (same math as the torch module).
    avg = jnp.mean(x, axis=(0, 2, 3))
    g4 = weight.reshape(1, C, 1, 1)
    b4 = bias.reshape(1, C, 1, 1)
    ref_train = (x - avg.reshape(1, C, 1, 1)) * g4 + b4
    ref_rm = (1.0 - momentum) * running_mean + momentum * avg
    ref_eval = (x - running_mean.reshape(1, C, 1, 1)) * g4 + b4

    # 1) training, VMEM-resident single-pass fast path.
    out_a, rm_a = mean_only_batchnorm_nchw(x, weight, bias, running_mean,
                                           momentum=momentum)
    # 2) training, streamed two-kernel path (what large activations take).
    out_b, rm_b = mean_only_batchnorm_nchw(x, weight, bias, running_mean,
                                           momentum=momentum,
                                           allow_fast_path=False)
    # 3) eval mode (uses running_mean; buffer unchanged).
    out_c, rm_c = mean_only_batchnorm_nchw(x, weight, bias, running_mean,
                                           momentum=momentum, training=False)
    jax.block_until_ready((out_a, rm_a, out_b, rm_b, out_c, rm_c))

    assert jnp.allclose(out_a, ref_train, atol=1e-5, rtol=1e-5)
    assert jnp.allclose(rm_a, ref_rm, atol=1e-6, rtol=1e-6)
    assert jnp.allclose(out_b, ref_train, atol=1e-5, rtol=1e-5)
    assert jnp.allclose(rm_b, ref_rm, atol=1e-6, rtol=1e-6)
    assert jnp.allclose(out_c, ref_eval, atol=1e-5, rtol=1e-5)
    assert jnp.allclose(rm_c, running_mean)
    print("KERNEL_OK")
</pallas_src>

<mosaic_0001>
module attributes {stable_mosaic.version = 11 : i64} {
  func.func @_resident_kernel(%arg0: i32, %arg1: memref<2x4x256xf32, #tpu.memory_space<vmem>>, %arg2: memref<4x1xf32, #tpu.memory_space<vmem>>, %arg3: memref<4x1xf32, #tpu.memory_space<vmem>>, %arg4: memref<4x1xf32, #tpu.memory_space<vmem>>, %arg5: memref<2x4x256xf32, #tpu.memory_space<vmem>>, %arg6: memref<4x1xf32, #tpu.memory_space<vmem>>) attributes {dimension_semantics = [#tpu.dimension_semantics<arbitrary>], iteration_bounds = array<i64: 1>, scalar_prefetch = 0 : i64, scratch_operands = 0 : i64, tpu.core_type = #tpu.core_type<tc>, window_params = [{pipeline_mode = #tpu.pipeline_mode<synchronous>, transform_indices = @transform_0, window_bounds = array<i64: 2, 4, 256>}, {pipeline_mode = #tpu.pipeline_mode<synchronous>, transform_indices = @transform_1, window_bounds = array<i64: 4, 1>}, {pipeline_mode = #tpu.pipeline_mode<synchronous>, transform_indices = @transform_2, window_bounds = array<i64: 4, 1>}, {pipeline_mode = #tpu.pipeline_mode<synchronous>, transform_indices = @transform_3, window_bounds = array<i64: 4, 1>}, {pipeline_mode = #tpu.pipeline_mode<synchronous>, transform_indices = @transform_4, window_bounds = array<i64: 2, 4, 256>}, {pipeline_mode = #tpu.pipeline_mode<synchronous>, transform_indices = @transform_5, window_bounds = array<i64: 4, 1>}]} {
    %c0 = arith.constant 0 : index
    %c0_0 = arith.constant 0 : index
    %c0_1 = arith.constant 0 : index
    %0 = vector.load %arg1[%c0, %c0_0, %c0_1] : memref<2x4x256xf32, #tpu.memory_space<vmem>>, vector<2x4x256xf32>
    %cst = arith.constant dense<0.000000e+00> : vector<2x4xf32>
    %1 = vector.multi_reduction <add>, %0, %cst [2] : vector<2x4x256xf32> to vector<2x4xf32>
    %2 = vector.shape_cast %1 : vector<2x4xf32> to vector<2x4x1xf32>
    %cst_2 = arith.constant dense<0.000000e+00> : vector<4x1xf32>
    %3 = vector.multi_reduction <add>, %2, %cst_2 [0] : vector<2x4x1xf32> to vector<4x1xf32>
    %cst_3 = arith.constant 0.001953125 : f32
    %4 = vector.broadcast %cst_3 : f32 to vector<4x1xf32>
    %5 = arith.mulf %3, %4 : vector<4x1xf32>
    %c0_4 = arith.constant 0 : index
    %c0_5 = arith.constant 0 : index
    %6 = vector.load %arg2[%c0_4, %c0_5] : memref<4x1xf32, #tpu.memory_space<vmem>>, vector<4x1xf32>
    %c0_6 = arith.constant 0 : index
    %c0_7 = arith.constant 0 : index
    %7 = vector.load %arg3[%c0_6, %c0_7] : memref<4x1xf32, #tpu.memory_space<vmem>>, vector<4x1xf32>
    %8 = arith.mulf %5, %6 : vector<4x1xf32>
    %9 = arith.subf %7, %8 : vector<4x1xf32>
    %c0_8 = arith.constant 0 : index
    %c0_9 = arith.constant 0 : index
    %10 = vector.load %arg4[%c0_8, %c0_9] : memref<4x1xf32, #tpu.memory_space<vmem>>, vector<4x1xf32>
    %cst_10 = arith.constant 0.899999976 : f32
    %11 = vector.broadcast %cst_10 : f32 to vector<4x1xf32>
    %12 = arith.mulf %11, %10 : vector<4x1xf32>
    %cst_11 = arith.constant 1.000000e-01 : f32
    %13 = vector.broadcast %cst_11 : f32 to vector<4x1xf32>
    %14 = arith.mulf %13, %5 : vector<4x1xf32>
    %15 = arith.addf %12, %14 : vector<4x1xf32>
    %c0_12 = arith.constant 0 : index
    %c0_13 = arith.constant 0 : index
    %16 = vector.load %arg6[%c0_12, %c0_13] : memref<4x1xf32, #tpu.memory_space<vmem>>, vector<4x1xf32>
    tpu.vector_store %arg6[%c0_12, %c0_13], %15 {strides = array<i32>} : memref<4x1xf32, #tpu.memory_space<vmem>>, vector<4x1xf32>,
    %17 = vector.shape_cast %6 : vector<4x1xf32> to vector<1x4x1xf32>
    %18 = vector.broadcast %17 : vector<1x4x1xf32> to vector<2x4x256xf32>
    %19 = arith.mulf %0, %18 : vector<2x4x256xf32>
    %20 = vector.shape_cast %9 : vector<4x1xf32> to vector<1x4x1xf32>
    %21 = vector.broadcast %20 : vector<1x4x1xf32> to vector<2x4x256xf32>
    %22 = arith.addf %19, %21 : vector<2x4x256xf32>
    %c0_14 = arith.constant 0 : index
    %c0_15 = arith.constant 0 : index
    %c0_16 = arith.constant 0 : index
    %23 = vector.load %arg5[%c0_14, %c0_15, %c0_16] : memref<2x4x256xf32, #tpu.memory_space<vmem>>, vector<2x4x256xf32>
    tpu.vector_store %arg5[%c0_14, %c0_15, %c0_16], %22 {strides = array<i32>} : memref<2x4x256xf32, #tpu.memory_space<vmem>>, vector<2x4x256xf32>,
    return
  }
  func.func @transform_0(%arg0: i32) -> (i32, i32, i32) {
    %c0_i32 = arith.constant 0 : i32
    %c0_i32_0 = arith.constant 0 : i32
    %c0_i32_1 = arith.constant 0 : i32
    %c0_i32_2 = arith.constant 0 : i32
    return %c0_i32, %c0_i32_0, %c0_i32_1 : i32, i32, i32
  }
  func.func @transform_1(%arg0: i32) -> (i32, i32) {
    %c0_i32 = arith.constant 0 : i32
    %c0_i32_0 = arith.constant 0 : i32
    %c0_i32_1 = arith.constant 0 : i32
    return %c0_i32, %c0_i32_0 : i32, i32
  }
  func.func @transform_2(%arg0: i32) -> (i32, i32) {
    %c0_i32 = arith.constant 0 : i32
    %c0_i32_0 = arith.constant 0 : i32
    %c0_i32_1 = arith.constant 0 : i32
    return %c0_i32, %c0_i32_0 : i32, i32
  }
  func.func @transform_3(%arg0: i32) -> (i32, i32) {
    %c0_i32 = arith.constant 0 : i32
    %c0_i32_0 = arith.constant 0 : i32
    %c0_i32_1 = arith.constant 0 : i32
    return %c0_i32, %c0_i32_0 : i32, i32
  }
  func.func @transform_4(%arg0: i32) -> (i32, i32, i32) {
    %c0_i32 = arith.constant 0 : i32
    %c0_i32_0 = arith.constant 0 : i32
    %c0_i32_1 = arith.constant 0 : i32
    %c0_i32_2 = arith.constant 0 : i32
    return %c0_i32, %c0_i32_0, %c0_i32_1 : i32, i32, i32
  }
  func.func @transform_5(%arg0: i32) -> (i32, i32) {
    %c0_i32 = arith.constant 0 : i32
    %c0_i32_0 = arith.constant 0 : i32
    %c0_i32_1 = arith.constant 0 : i32
    return %c0_i32, %c0_i32_0 : i32, i32
  }
}

</mosaic_0001>

<bundles_post_ra>
// kernel: tpu_custom_call.1
= control target key start
LH: loop header
LB: loop body
LE: loop exit
PB: predicated region body
PF: predicated region fallthrough
CT: control target
= control target key end

     0   :  { %11 = vsyncpa [#allocation3], 0  ;;  %s249_s0 = inlined_call_operand.hbm [shape: f32[2,4,256], index: 0, kind: input, shape index: {}]   ;;  %s250_s1 = inlined_call_operand.vmem [shape: f32[4,1], index: 1, kind: input, shape index: {}]   ;;  %s251_s2 = inlined_call_operand.vmem [shape: f32[4,1], index: 2, kind: input, shape index: {}]   ;;  %s252_s3 = inlined_call_operand.vmem [shape: f32[4,1], index: 3, kind: input, shape index: {}]   ;;  %s253_s4 = inlined_call_operand.hbm [shape: f32[2,4,256], index: 4, kind: output, shape index: {0}]   ;;  %s254_s5 = inlined_call_operand.vmem [shape: f32[4,1], index: 5, kind: output, shape index: {1}]  }
   0x1   :  { %12 = vsyncpa [#allocation4], 0  ;;  %s17_s20 = sshll.u32 %s249_s0, 4  ;;  %s183_s21 = smov [#allocation2]   ;;  %s18_s20 = int_to_ptr.hbm [resolvable:$true] %s17_s20 }
   0x2   :  { %s19_s22 = sshll.u32 %s183_s21, 4  ;;  %s184_s23 = smov 128   ;;  %s20_s22 = int_to_ptr.vmem [resolvable:$true] %s19_s22 }
   0x3   :  { %s185_s24 = smov 8  }
   0x4   :  { %25 = dma.hbm_to_vmem [thread:$0]  %s18_s20, 256, %s20_s22, [#allocation3], %s184_s23, %s184_s23, %s185_s24  }
   0x5   :  { %179 = dma.done.wait [#allocation3], 256  }
   0x6   :  { %180 = vsyncadd [#allocation3], 4294967040  ;;  %v36_v0 = vld [vmem:[#allocation2] sm:$0xff]  ;;  %v37_v1 = vld [vmem:[#allocation2 + $0x8] sm:$0xff]  ;;  %vm51_vm0 = vcmask 1043456   ;;  %v186_v12 = vmov 0  }
   0x7   :  { %40 = vst [vmem:[#allocation1] ss:$2 sm:$0xff] %v36_v0  ;;  %129 = vset.pattern.permute.xlu1 %v186_v12  ;;  %v66_v13 = vld [vmem:[%s250_s1] sm:$0xf]  ;;  %130 = vset.pattern.permute.xlu0 %v186_v12  ;;  %vm74_vm1 = vcmask 3072   ;;  %s106_s8 = sshll.u32 %s253_s4, 4  ;;  %s107_s8 = int_to_ptr.hbm [resolvable:$true] %s106_s8 }
   0x8   :  { %44 = vst [vmem:[#allocation1 + $0x10] ss:$2 sm:$0xff] %v37_v1  ;;  %78 = vperm.xlu1 %129, %v66_v13   ;;  %v70_v17 = vld [vmem:[%s252_s3] sm:$0xf]  ;;  %v187_v27 = vmov 839922192  }
   0x9   :  { %v71_v20 = vmul.f32 0.9, %v70_v17  ;;  %v67_v22 = vld [vmem:[%s251_s2] sm:$0xf]  ;;  %v81_v28 = vunpack.c.l.s4 %v187_v27  ;;  %s188_s2 = smov [#allocation5]  }
   0xa   :  { %s104_s3 = sshll.u32 %s188_s2, 4  ;;  %s105_s3 = int_to_ptr.vmem [resolvable:$true] %s104_s3 }
   0xb   :  { %v82_v30 = vunpack.c.0.s8 %v81_v28 }
   0xe   :  { %v41_v2 = vld.sshfl [vmem:[#allocation1] sm:$0xff pattern:$0x75316420]  ;;  %v42_v3 = vld.sshfl [vmem:[#allocation1 + $0x8] sm:$0xff pattern:$0x75316420] }
   0xf   :  { %v52_v4 = vsel %vm51_vm0, %v41_v2, 0.0  ;;  %v53_v5 = vsel %vm51_vm0, %v42_v3, 0.0  ;;  %v45_v7 = vld.sshfl [vmem:[#allocation1 + $0x10] sm:$0xff pattern:$0x75316420] }
  0x10   :  { %v54_v6 = vadd.f32 %v53_v5, %v52_v4  ;;  %v46_v8 = vld.sshfl [vmem:[#allocation1 + $0x18] sm:$0xff pattern:$0x75316420]  ;;  %v57_v9 = vsel %vm51_vm0, %v45_v7, 0.0 }
  0x11   :  { %v58_v10 = vsel %vm51_vm0, %v46_v8, 0.0 }
  0x12   :  { %55 = vadd.xlane.f32.xlu0 %v54_v6  ;;  %v59_v11 = vadd.f32 %v58_v10, %v57_v9 }
  0x1a   :  { %60 = vadd.xlane.f32.xlu0 %v59_v11 }
  0x7a   :  { %v79_v29 = vpop.permute.xlu1 %78 }
  0x7b   :  { %v83_v31 = vperm.slane %v79_v29, %v82_v30 }
  0x7d   :  { %v85_v33 = vmul.f32 %v83_v31, %v36_v0  ;;  %v86_v34 = vmul.f32 %v83_v31, %v37_v1 }
  0x85   :  { %v56_v14 = vpop.xlane.xlu0 %55 }
  0x86   :  { %v62_v16 = vsel %vm51_vm0, %v56_v14, 0.0 }
  0x8d   :  { %v61_v15 = vpop.xlane.xlu0 %60 }
  0x8e   :  { %v63_v18 = vsel %vm51_vm0, %v61_v15, 0.0 }
  0x8f   :  { %v64_v19 = vadd.f32 %v63_v18, %v62_v16 }
  0x91   :  { %v65_v21 = vmul.f32 0.001953125, %v64_v19 }
  0x93   :  { %v72_v23 = vmul.f32 0.1, %v65_v21  ;;  %v68_v24 = vmul.f32 %v66_v13, %v65_v21 }
  0x95   :  { %v73_v25 = vadd.f32 %v72_v23, %v71_v20  ;;  %v69_v26 = vsub.f32 %v67_v22, %v68_v24 }
  0x97   :  { %75 = vst.msk [vmem:[%s254_s5] sm:$0xf] %vm74_vm1, %v73_v25  ;;  %89 = vperm.xlu1 %129, %v69_v26  }
 0x109   :  { %v90_v32 = vpop.permute.xlu1 %89 }
 0x10a   :  { %v94_v35 = vperm.slane %v90_v32, %v82_v30 }
 0x10c   :  { %v96_v36 = vadd.f32 %v94_v35, %v85_v33  ;;  %v97_v37 = vadd.f32 %v94_v35, %v86_v34 }
 0x10e   :  { %98 = vst [vmem:[#allocation5] sm:$0xff] %v96_v36 }
 0x10f   :  { %99 = vst [vmem:[#allocation5 + $0x8] sm:$0xff] %v97_v37 }
 0x110   :  { %112 = dma.vmem_to_hbm [thread:$0]  %s105_s3, 256, %s107_s8, [#allocation4], %s184_s23, %s184_s23, %s185_s24  }
 0x111   :  { %181 = dma.done.wait [#allocation4], 256  }
 0x112   :  { %182 = vsyncadd [#allocation4], 4294967040 }
 0x113   :  { %121 = vsyncpa [#allocation3], 1 }
 0x114   :  { %122 = vsyncpa [#allocation4], 1 }

</bundles_post_ra>
